<compile_context>
chip_gen: v7x
topology: tpu7x:2x2x1
jax: 0.10.0
libtpu: 0.0.40
codegen_flags: <defaults>
</compile_context>

<pallas_src>
import functools

import jax
import jax.numpy as jnp
from jax.experimental import pallas as pl
from jax.experimental.pallas import tpu as pltpu


# --------------------------------------------------------------------------- #
# Kernel 1: conv matmul (bf16 -> f32) + per-channel sum / sum-of-squares.
# Grid = (G "parallel", S "arbitrary"); partial stats are per-g accumulators.
# --------------------------------------------------------------------------- #
def conv_stats_kernel(p_ref, w_ref, y_ref, sum_ref, sq_ref):
    s = pl.program_id(1)  # inner reduction step

    y = jnp.dot(p_ref[...], w_ref[...], preferred_element_type=jnp.float32)
    y_ref[...] = y

    @pl.when(s == 0)
    def _():
        sum_ref[...] = jnp.zeros_like(sum_ref)
        sq_ref[...] = jnp.zeros_like(sq_ref)

    # Per-channel reductions on the MXU (ones-row matmul); the MXU has slack when
    # Cout is small, which keeps VPU/XLU slots free.
    ones = jnp.ones((1, y.shape[0]), jnp.float32)
    sum_ref[...] += jnp.dot(ones, y, preferred_element_type=jnp.float32)[None]
    sq_ref[...] += jnp.dot(ones, y * y, preferred_element_type=jnp.float32)[None]


# --------------------------------------------------------------------------- #
# Kernel 2: fused BatchNorm scale/shift + ReLU on a lane-dense (R, r*Cout) view.
# --------------------------------------------------------------------------- #
def bn_relu_kernel(y_ref, scale_ref, shift_ref, o_ref, *, apply_relu):
    y = y_ref[...] * scale_ref[...] + shift_ref[...]
    if apply_relu:
        y = jnp.maximum(y, 0.0)
    o_ref[...] = y


# --------------------------------------------------------------------------- #
# Helpers (wrapper side, plain XLA)
# --------------------------------------------------------------------------- #
def _im2col(x, kh, kw, stride, padding, dilation):
    """x: (N, C, H, W) -> patches (N*Ho*Wo, C*kh*kw), Ho, Wo. Keeps x's dtype."""
    N, C, H, W = x.shape
    xp = jnp.pad(x, ((0, 0), (0, 0), (padding, padding), (padding, padding)))
    Ho = (H + 2 * padding - dilation * (kh - 1) - 1) // stride + 1
    Wo = (W + 2 * padding - dilation * (kw - 1) - 1) // stride + 1
    cols = []
    for i in range(kh):
        for j in range(kw):
            cols.append(
                xp[:, :,
                   i * dilation:i * dilation + stride * Ho:stride,
                   j * dilation:j * dilation + stride * Wo:stride])
    p = jnp.stack(cols, axis=2)          # (N, C, kh*kw, Ho, Wo)
    p = p.transpose(0, 3, 4, 1, 2)       # (N, Ho, Wo, C, kh*kw)
    return p.reshape(N * Ho * Wo, C * kh * kw), Ho, Wo


def _round_up(a, b):
    return ((a + b - 1) // b) * b


def _pick_tm(M, K, Cout, vmem_budget_bytes):
    """Largest power-of-two tm (<=1024) whose double-buffered tiles fit the budget."""
    tm = 1024
    while tm > 128:
        need = 2 * (tm * K * 2 + K * Cout * 2 + tm * Cout * 4)  # bf16 in, f32 out
        if need <= vmem_budget_bytes:
            break
        tm //= 2
    # don't tile past M (avoid pointless zero-padding work)
    return min(tm, _round_up(M, 128))


def _fold_lane_dense(Mp, Cout):
    """Fold factor r so r*Cout is a multiple of 128 -> unmasked lane-dense stores."""
    for lanes in (512, 256, 128):
        if lanes % Cout == 0:
            r = lanes // Cout
            if Mp % r == 0:
                return r
    return 1


def _pick_row_block(R, cap=1024):
    if R <= cap:
        return R
    tb = cap - (cap % 8)
    while tb >= 8:
        if R % tb == 0:
            return tb
        tb -= 8
    return R  # rare fallback: single block


# --------------------------------------------------------------------------- #
# Forward of BasicConv.
# --------------------------------------------------------------------------- #
def basic_conv(x, weight, gamma, beta, *, stride=1, padding=0, dilation=1,
               relu=True, bn=True, eps=1e-5, vmem_budget=24 * 1024 * 1024):
    """x: (N, Cin, H, W) float32; weight: (Cout, Cin, kh, kw). Returns NCHW f32."""
    # TODO(synk): groups > 1 and bias=True (non-default ctor args) are not supported.
    # TODO(synk): BatchNorm here always uses batch statistics (train mode); no
    #             running-stats eval path.
    # TODO(synk): the im2col patch gather is still materialized in HBM by XLA (in
    #             bf16); a fully fused tap-matmul with manual DMA over an NHWC input
    #             would remove that round-trip for large Cin.
    # TODO(synk): for very large K = Cin*kh*kw, add a K grid axis with a VMEM f32
    #             accumulator (standard P3 pattern) instead of full-K blocks.
    N, Cin, H, W = x.shape
    Cout, _, kh, kw = weight.shape

    # im2col in bf16 (MXU-native; halves traffic on the kh*kw-inflated tensor).
    patches, Ho, Wo = _im2col(x.astype(jnp.bfloat16), kh, kw, stride, padding, dilation)
    M, K = patches.shape

    tm = _pick_tm(M, K, Cout, vmem_budget)
    Mp = _round_up(M, tm)
    if Mp != M:
        # zero rows contribute zero to the conv output and to the stat sums
        patches = jnp.pad(patches, ((0, Mp - M), (0, 0)))
    wmat = weight.reshape(Cout, K).T.astype(jnp.bfloat16)   # (K, Cout)

    n_blk = Mp // tm
    G = 2 if n_blk % 2 == 0 else 1          # outer "parallel" axis (v7x megacore)
    S = n_blk // G

    cost1 = pl.CostEstimate(
        flops=2 * Mp * K * Cout + 4 * Mp * Cout,
        transcendentals=0,
        bytes_accessed=Mp * K * 2 + K * Cout * 2 + Mp * Cout * 4)

    conv_out, psum, psq = pl.pallas_call(
        conv_stats_kernel,
        out_shape=(jax.ShapeDtypeStruct((Mp, Cout), jnp.float32),
                   jax.ShapeDtypeStruct((G, 1, Cout), jnp.float32),
                   jax.ShapeDtypeStruct((G, 1, Cout), jnp.float32)),
        grid_spec=pltpu.PrefetchScalarGridSpec(
            num_scalar_prefetch=0, grid=(G, S),
            in_specs=[pl.BlockSpec((tm, K), lambda g, s: (g * S + s, 0)),
                      pl.BlockSpec((K, Cout), lambda g, s: (0, 0))],
            out_specs=(pl.BlockSpec((tm, Cout), lambda g, s: (g * S + s, 0)),
                       pl.BlockSpec((1, 1, Cout), lambda g, s: (g, 0, 0)),
                       pl.BlockSpec((1, 1, Cout), lambda g, s: (g, 0, 0)))),
        compiler_params=pltpu.CompilerParams(
            dimension_semantics=("parallel", "arbitrary"),
            vmem_limit_bytes=32 * 1024 * 1024),
        cost_estimate=cost1,
    )(patches, wmat)

    # Reduce per-core partial stats; fold BN into a per-channel scale/shift.
    csum = jnp.sum(psum, axis=0)[0]          # (Cout,)
    csq = jnp.sum(psq, axis=0)[0]            # (Cout,)
    if bn:
        count = jnp.float32(M)               # valid elements per channel = N*Ho*Wo
        mean = csum / count
        var = jnp.maximum(csq / count - mean * mean, 0.0)  # biased var (train mode)
        scale = gamma.astype(jnp.float32) / jnp.sqrt(var + eps)
        shift = beta.astype(jnp.float32) - mean * scale
    else:
        scale = jnp.ones((Cout,), jnp.float32)
        shift = jnp.zeros((Cout,), jnp.float32)

    # Lane-dense view for the elementwise pass: (Mp, Cout) -> (R, r*Cout),
    # r*Cout multiple of 128 -> unmasked wide stores. Pure row-major view (free).
    r = _fold_lane_dense(Mp, Cout)
    L = r * Cout
    R = Mp // r
    y2 = conv_out.reshape(R, L)
    scale2 = jnp.tile(scale, (r,)).reshape(1, L)
    shift2 = jnp.tile(shift, (r,)).reshape(1, L)

    tb = _pick_row_block(R)
    cost2 = pl.CostEstimate(flops=2 * R * L, transcendentals=0,
                            bytes_accessed=2 * R * L * 4 + 2 * L * 4)

    out = pl.pallas_call(
        functools.partial(bn_relu_kernel, apply_relu=relu),
        out_shape=jax.ShapeDtypeStruct((R, L), jnp.float32),
        grid_spec=pltpu.PrefetchScalarGridSpec(
            num_scalar_prefetch=0, grid=(R // tb,),
            in_specs=[pl.BlockSpec((tb, L), lambda i: (i, 0)),
                      pl.BlockSpec((1, L), lambda i: (0, 0)),
                      pl.BlockSpec((1, L), lambda i: (0, 0))],
            out_specs=pl.BlockSpec((tb, L), lambda i: (i, 0))),
        compiler_params=pltpu.CompilerParams(
            dimension_semantics=("parallel",),
            vmem_limit_bytes=32 * 1024 * 1024),
        cost_estimate=cost2,
        input_output_aliases={0: 0},   # overwrite conv_out in place (saves one HBM buf)
    )(y2, scale2, shift2)

    # Back to NCHW (module semantics). The trailing transpose is an XLA pass.
    out = out.reshape(Mp, Cout)[:M].reshape(N, Ho, Wo, Cout).transpose(0, 3, 1, 2)
    return out


# --------------------------------------------------------------------------- #
# Pure-JAX reference
# --------------------------------------------------------------------------- #
def _reference(x, weight, gamma, beta, *, stride, padding, dilation, relu, bn,
               eps=1e-5, conv_dtype=jnp.float32):
    y = jax.lax.conv_general_dilated(
        x.astype(conv_dtype), weight.astype(conv_dtype),
        window_strides=(stride, stride),
        padding=[(padding, padding), (padding, padding)],
        rhs_dilation=(dilation, dilation),
        dimension_numbers=("NCHW", "OIHW", "NCHW"),
        preferred_element_type=jnp.float32)
    if bn:
        mean = y.mean(axis=(0, 2, 3))
        var = y.var(axis=(0, 2, 3))
        y = (y - mean[None, :, None, None]) / jnp.sqrt(var + eps)[None, :, None, None]
        y = y * gamma[None, :, None, None] + beta[None, :, None, None]
    if relu:
        y = jnp.maximum(y, 0.0)
    return y


if __name__ == "__main__":
    # BasicConv(in_planes=4, out_planes=8, kernel_size=3, stride=1, padding=1)
    N, Cin, H, W = 2, 4, 16, 16
    Cout, ksize, stride, padding, dilation = 8, 3, 1, 1, 1

    key = jax.random.PRNGKey(0)
    kx, kw_, kg, kb = jax.random.split(key, 4)
    x = jax.random.normal(kx, (N, Cin, H, W), dtype=jnp.float32)
    fan_in = Cin * ksize * ksize
    weight = jax.random.normal(kw_, (Cout, Cin, ksize, ksize),
                               dtype=jnp.float32) / jnp.sqrt(fan_in)
    gamma = 1.0 + 0.1 * jax.random.normal(kg, (Cout,), dtype=jnp.float32)
    beta = 0.1 * jax.random.normal(kb, (Cout,), dtype=jnp.float32)

    out = basic_conv(x, weight, gamma, beta,
                     stride=stride, padding=padding, dilation=dilation,
                     relu=True, bn=True)
    out = jax.block_until_ready(out)
    assert out.shape == (N, Cout, H, W)

    # Matched-precision reference (conv inputs in bf16, f32 accumulation) — tight.
    ref_bf16 = _reference(x, weight, gamma, beta, stride=stride, padding=padding,
                          dilation=dilation, relu=True, bn=True,
                          conv_dtype=jnp.bfloat16)
    assert jnp.allclose(out, ref_bf16, atol=2e-3, rtol=2e-3), \
        float(jnp.max(jnp.abs(out - ref_bf16)))

    # Full-f32 reference — looser tolerance accounts for the bf16 MXU matmul.
    ref_f32 = _reference(x, weight, gamma, beta, stride=stride, padding=padding,
                         dilation=dilation, relu=True, bn=True,
                         conv_dtype=jnp.float32)
    assert jnp.allclose(out, ref_f32, atol=5e-2, rtol=5e-2), \
        float(jnp.max(jnp.abs(out - ref_f32)))

    print("KERNEL_OK")
</pallas_src>

<mosaic_0001>
module attributes {stable_mosaic.version = 11 : i64} {
  func.func @conv_stats_kernel(%arg0: i32, %arg1: i32, %arg2: memref<512x36xbf16, #tpu.memory_space<vmem>>, %arg3: memref<36x8xbf16, #tpu.memory_space<vmem>>, %arg4: memref<512x8xf32, #tpu.memory_space<vmem>>, %arg5: memref<1x1x8xf32, #tpu.memory_space<vmem>>, %arg6: memref<1x1x8xf32, #tpu.memory_space<vmem>>) attributes {dimension_semantics = [#tpu.dimension_semantics<parallel>, #tpu.dimension_semantics<arbitrary>], iteration_bounds = array<i64: 1, 1>, scalar_prefetch = 0 : i64, scratch_operands = 0 : i64, tpu.core_type = #tpu.core_type<tc>, window_params = [{transform_indices = @transform_0, window_bounds = array<i64: 512, 36>}, {pipeline_mode = #tpu.pipeline_mode<synchronous>, transform_indices = @transform_1, window_bounds = array<i64: 36, 8>}, {transform_indices = @transform_2, window_bounds = array<i64: 512, 8>}, {transform_indices = @transform_3, window_bounds = array<i64: 1, 1, 8>}, {transform_indices = @transform_4, window_bounds = array<i64: 1, 1, 8>}]} {
    %c0 = arith.constant 0 : index
    %c0_0 = arith.constant 0 : index
    %0 = vector.load %arg2[%c0, %c0_0] : memref<512x36xbf16, #tpu.memory_space<vmem>>, vector<512x36xbf16>
    %c0_1 = arith.constant 0 : index
    %c0_2 = arith.constant 0 : index
    %1 = vector.load %arg3[%c0_1, %c0_2] : memref<36x8xbf16, #tpu.memory_space<vmem>>, vector<36x8xbf16>
    %cst = arith.constant dense<0.000000e+00> : vector<512x8xf32>
    %2 = tpu.matmul %0, %1, %cst {dimension_numbers = #tpu.dot_dimension_numbers<[1], [0], [0], [1], [0, 0, 1, 1], [], []>} : vector<512x36xbf16>, vector<36x8xbf16>, vector<512x8xf32> -> vector<512x8xf32>
    %c0_3 = arith.constant 0 : index
    %c0_4 = arith.constant 0 : index
    %3 = vector.load %arg4[%c0_3, %c0_4] : memref<512x8xf32, #tpu.memory_space<vmem>>, vector<512x8xf32>
    tpu.vector_store %arg4[%c0_3, %c0_4], %2 {strides = array<i32>} : memref<512x8xf32, #tpu.memory_space<vmem>>, vector<512x8xf32>,
    %c0_i32 = arith.constant 0 : i32
    %4 = arith.cmpi eq, %arg1, %c0_i32 : i32
    %5 = arith.extui %4 : i1 to i32
    %c0_i32_5 = arith.constant 0 : i32
    %6 = arith.cmpi ne, %5, %c0_i32_5 : i32
    scf.if %6 {
      %cst_21 = arith.constant 0.000000e+00 : f32
      %19 = vector.broadcast %cst_21 : f32 to vector<1x1x8xf32>
      %c0_22 = arith.constant 0 : index
      %c0_23 = arith.constant 0 : index
      %c0_24 = arith.constant 0 : index
      %20 = vector.load %arg5[%c0_22, %c0_23, %c0_24] : memref<1x1x8xf32, #tpu.memory_space<vmem>>, vector<1x1x8xf32>
      tpu.vector_store %arg5[%c0_22, %c0_23, %c0_24], %19 {strides = array<i32>} : memref<1x1x8xf32, #tpu.memory_space<vmem>>, vector<1x1x8xf32>,
      %cst_25 = arith.constant 0.000000e+00 : f32
      %21 = vector.broadcast %cst_25 : f32 to vector<1x1x8xf32>
      %c0_26 = arith.constant 0 : index
      %c0_27 = arith.constant 0 : index
      %c0_28 = arith.constant 0 : index
      %22 = vector.load %arg6[%c0_26, %c0_27, %c0_28] : memref<1x1x8xf32, #tpu.memory_space<vmem>>, vector<1x1x8xf32>
      tpu.vector_store %arg6[%c0_26, %c0_27, %c0_28], %21 {strides = array<i32>} : memref<1x1x8xf32, #tpu.memory_space<vmem>>, vector<1x1x8xf32>,
    } else {
    }
    %cst_6 = arith.constant 1.000000e+00 : f32
    %7 = vector.broadcast %cst_6 : f32 to vector<1x512xf32>
    %c0_7 = arith.constant 0 : index
    %c0_8 = arith.constant 0 : index
    %c0_9 = arith.constant 0 : index
    %8 = vector.load %arg5[%c0_7, %c0_8, %c0_9] : memref<1x1x8xf32, #tpu.memory_space<vmem>>, vector<1x1x8xf32>
    %cst_10 = arith.constant dense<0.000000e+00> : vector<1x8xf32>
    %9 = tpu.matmul %7, %2, %cst_10 {dimension_numbers = #tpu.dot_dimension_numbers<[1], [0], [0], [1], [0, 0, 1, 1], [], []>} : vector<1x512xf32>, vector<512x8xf32>, vector<1x8xf32> -> vector<1x8xf32>
    %10 = vector.shape_cast %9 : vector<1x8xf32> to vector<1x1x8xf32>
    %11 = arith.addf %8, %10 : vector<1x1x8xf32>
    %c0_11 = arith.constant 0 : index
    %c0_12 = arith.constant 0 : index
    %c0_13 = arith.constant 0 : index
    %12 = vector.load %arg5[%c0_11, %c0_12, %c0_13] : memref<1x1x8xf32, #tpu.memory_space<vmem>>, vector<1x1x8xf32>
    tpu.vector_store %arg5[%c0_11, %c0_12, %c0_13], %11 {strides = array<i32>} : memref<1x1x8xf32, #tpu.memory_space<vmem>>, vector<1x1x8xf32>,
    %c0_14 = arith.constant 0 : index
    %c0_15 = arith.constant 0 : index
    %c0_16 = arith.constant 0 : index
    %13 = vector.load %arg6[%c0_14, %c0_15, %c0_16] : memref<1x1x8xf32, #tpu.memory_space<vmem>>, vector<1x1x8xf32>
    %14 = arith.mulf %2, %2 : vector<512x8xf32>
    %cst_17 = arith.constant dense<0.000000e+00> : vector<1x8xf32>
    %15 = tpu.matmul %7, %14, %cst_17 {dimension_numbers = #tpu.dot_dimension_numbers<[1], [0], [0], [1], [0, 0, 1, 1], [], []>} : vector<1x512xf32>, vector<512x8xf32>, vector<1x8xf32> -> vector<1x8xf32>
    %16 = vector.shape_cast %15 : vector<1x8xf32> to vector<1x1x8xf32>
    %17 = arith.addf %13, %16 : vector<1x1x8xf32>
    %c0_18 = arith.constant 0 : index
    %c0_19 = arith.constant 0 : index
    %c0_20 = arith.constant 0 : index
    %18 = vector.load %arg6[%c0_18, %c0_19, %c0_20] : memref<1x1x8xf32, #tpu.memory_space<vmem>>, vector<1x1x8xf32>
    tpu.vector_store %arg6[%c0_18, %c0_19, %c0_20], %17 {strides = array<i32>} : memref<1x1x8xf32, #tpu.memory_space<vmem>>, vector<1x1x8xf32>,
    return
  }
  func.func @transform_0(%arg0: i32, %arg1: i32) -> (i32, i32) {
    %c1_i32 = arith.constant 1 : i32
    %0 = arith.muli %arg0, %c1_i32 : i32
    %1 = arith.addi %0, %arg1 : i32
    %c0_i32 = arith.constant 0 : i32
    %c0_i32_0 = arith.constant 0 : i32
    return %1, %c0_i32 : i32, i32
  }
  func.func @transform_1(%arg0: i32, %arg1: i32) -> (i32, i32) {
    %c0_i32 = arith.constant 0 : i32
    %c0_i32_0 = arith.constant 0 : i32
    %c0_i32_1 = arith.constant 0 : i32
    return %c0_i32, %c0_i32_0 : i32, i32
  }
  func.func @transform_2(%arg0: i32, %arg1: i32) -> (i32, i32) {
    %c1_i32 = arith.constant 1 : i32
    %0 = arith.muli %arg0, %c1_i32 : i32
    %1 = arith.addi %0, %arg1 : i32
    %c0_i32 = arith.constant 0 : i32
    %c0_i32_0 = arith.constant 0 : i32
    return %1, %c0_i32 : i32, i32
  }
  func.func @transform_3(%arg0: i32, %arg1: i32) -> (i32, i32, i32) {
    %c0_i32 = arith.constant 0 : i32
    %c0_i32_0 = arith.constant 0 : i32
    %c0_i32_1 = arith.constant 0 : i32
    return %arg0, %c0_i32, %c0_i32_0 : i32, i32, i32
  }
  func.func @transform_4(%arg0: i32, %arg1: i32) -> (i32, i32, i32) {
    %c0_i32 = arith.constant 0 : i32
    %c0_i32_0 = arith.constant 0 : i32
    %c0_i32_1 = arith.constant 0 : i32
    return %arg0, %c0_i32, %c0_i32_0 : i32, i32, i32
  }
}

</mosaic_0001>

<bundles_post_ra>
// kernel: tpu_custom_call.1
= control target key start
LH: loop header
LB: loop body
LE: loop exit
PB: predicated region body
PF: predicated region fallthrough
CT: control target
= control target key end

     0   :  { %10 = vsyncpa [#allocation3], 0  ;;  %vm297_vm0 = vcmask 293888   ;;  %vm394_vm1 = vcmask 1041408   ;;  %s2654_s0 = inlined_call_operand.vmem [shape: bf16[512,36], index: 0, kind: input, shape index: {}]   ;;  %s2655_s1 = inlined_call_operand.vmem [shape: bf16[36,8], index: 1, kind: input, shape index: {}]   ;;  %s2656_s2 = inlined_call_operand.vmem [shape: f32[512,8], index: 2, kind: output, shape index: {0}]   ;;  %s2657_s3 = inlined_call_operand.hbm [shape: f32[1,1,8], index: 3, kind: output, shape index: {1}]   ;;  %s2658_s4 = inlined_call_operand.hbm [shape: f32[1,1,8], index: 4, kind: output, shape index: {2}]  }
   0x1   :  { %v1615_v0 = vld [vmem:[%s2655_s1] sm:$0xff]   ;;  %v1616_v1 = vld [vmem:[%s2655_s1 + $0x8] sm:$0xff]   ;;  %v1617_v2 = vld [vmem:[%s2655_s1 + $0x10] ss:$0 sps:$4 sm:$0x33]  }
   0x2   :  { %1412 = vmatprep.subr.bf16.mxu0 %v1615_v0  ;;  %v1618_v3 = vld [vmem:[%s2654_s0] sm:$0xff]   ;;  %v396_v4 = vsel %vm394_vm1, %v1617_v2, 0  ;;  %v1619_v5 = vld [vmem:[%s2654_s0 + $0x8] sm:$0xff]   ;;  %v1620_v6 = vld [vmem:[%s2654_s0 + $0x10] sm:$0xff]  }
   0x3   :  { %1413 = vmatpush3.bf16.msra.mxu0 %v1615_v0  ;;  %1418 = vmatprep.mubr.msk.bf16.mxu0 %vm297_vm0, %v1618_v3  ;;  %v1621_v7 = vld [vmem:[%s2654_s0 + $0x18] sm:$0xff]   ;;  %v1622_v8 = vld [vmem:[%s2654_s0 + $0x20] sm:$0xff]   ;;  %v1623_v9 = vld [vmem:[%s2654_s0 + $0x28] sm:$0xff]  }
   0x4   :  { %1414 = vmatprep.subr.bf16.mxu0 %v1616_v1  ;;  %v1624_v10 = vld [vmem:[%s2654_s0 + $0x30] sm:$0xff]   ;;  %v1625_v11 = vld [vmem:[%s2654_s0 + $0x38] sm:$0xff]  }
   0x7   :  { %1415 = vmatpush3.bf16.msra.mxu0 %v1616_v1 }
   0x8   :  { %1610 = vmatprep.subr.msk.bf16.mxu0 %vm394_vm1, %v1617_v2 }
   0xb   :  { %1417 = vmatpush3.bf16.msra.mxu0 %v396_v4 }
   0xe   :  { %1419 = vmatmul.mubr.msk.bf16.vlgmr.msra.gmra.mrb[0].mxu0 %vm297_vm0, %v1619_v5 }
   0xf   :  { %1422 = vmatprep.mubr.msk.bf16.mxu0 %vm297_vm0, %v1620_v6 }
  0x16   :  { %1423 = vmatmul.mubr.msk.bf16.gmra.mrb[4].mxu0 %vm297_vm0, %v1621_v7 }
  0x17   :  { %1426 = vmatprep.mubr.msk.bf16.mxu0 %vm297_vm0, %v1622_v8 }
  0x1e   :  { %1427 = vmatmul.mubr.msk.bf16.gmra.mrb[8].mxu0 %vm297_vm0, %v1623_v9 }
  0x1f   :  { %1430 = vmatprep.mubr.msk.bf16.mxu0 %vm297_vm0, %v1624_v10 }
  0x20   :  { %11 = vsyncpa [#allocation5], 0  ;;  %v1626_v12 = vld [vmem:[%s2654_s0 + $0x40] sm:$0xff]   ;;  %v1627_v13 = vld [vmem:[%s2654_s0 + $0x48] sm:$0xff]   ;;  %v2659_v36 = vmov 1.0   ;;  %vm687_vm2 = vcmask 64512  }
  0x21   :  { %v1628_v14 = vld [vmem:[%s2654_s0 + $0x50] sm:$0xff]   ;;  %v1629_v15 = vld [vmem:[%s2654_s0 + $0x58] sm:$0xff]   ;;  %v1630_v16 = vld [vmem:[%s2654_s0 + $0x60] sm:$0xff]   ;;  %824 = vmatprep.mubr.f32.mxu1 %v2659_v36  ;;  %vm756_vm3 = vcmask 57344  }
  0x22   :  { %v1631_v17 = vld [vmem:[%s2654_s0 + $0x68] sm:$0xff]   ;;  %v1632_v18 = vld [vmem:[%s2654_s0 + $0x70] sm:$0xff]   ;;  %v1633_v19 = vld [vmem:[%s2654_s0 + $0x78] sm:$0xff]  }
  0x23   :  { %v1634_v20 = vld [vmem:[%s2654_s0 + $0x80] sm:$0xff]   ;;  %v1635_v21 = vld [vmem:[%s2654_s0 + $0x88] sm:$0xff]   ;;  %v1636_v22 = vld [vmem:[%s2654_s0 + $0x90] sm:$0xff]  }
  0x24   :  { %v1637_v23 = vld [vmem:[%s2654_s0 + $0x98] sm:$0xff]   ;;  %v1638_v24 = vld [vmem:[%s2654_s0 + $0xa0] sm:$0xff]   ;;  %v1639_v25 = vld [vmem:[%s2654_s0 + $0xa8] sm:$0xff]  }
  0x25   :  { %v1640_v26 = vld [vmem:[%s2654_s0 + $0xb0] sm:$0xff]   ;;  %v1641_v27 = vld [vmem:[%s2654_s0 + $0xb8] sm:$0xff]   ;;  %v1642_v28 = vld [vmem:[%s2654_s0 + $0xc0] sm:$0xff]  }
  0x26   :  { %1431 = vmatmul.mubr.msk.bf16.gmra.mrb[12].mxu0 %vm297_vm0, %v1625_v11  ;;  %v1643_v29 = vld [vmem:[%s2654_s0 + $0xc8] sm:$0xff]   ;;  %v1644_v30 = vld [vmem:[%s2654_s0 + $0xd0] sm:$0xff]   ;;  %v1645_v31 = vld [vmem:[%s2654_s0 + $0xd8] sm:$0xff]  }
  0x27   :  { %1434 = vmatprep.mubr.msk.bf16.mxu0 %vm297_vm0, %v1626_v12  ;;  %v1646_v32 = vld [vmem:[%s2654_s0 + $0xe0] sm:$0xff]   ;;  %v1647_v33 = vld [vmem:[%s2654_s0 + $0xe8] sm:$0xff]   ;;  %v1648_v34 = vld [vmem:[%s2654_s0 + $0xf0] sm:$0xff]  }
  0x28   :  { %v1649_v35 = vld [vmem:[%s2654_s0 + $0xf8] sm:$0xff]  }
  0x2e   :  { %1435 = vmatmul.mubr.msk.bf16.gmra.mrb[16].mxu0 %vm297_vm0, %v1627_v13 }
  0x2f   :  { %1438 = vmatprep.mubr.msk.bf16.mxu0 %vm297_vm0, %v1628_v14 }
  0x36   :  { %1439 = vmatmul.mubr.msk.bf16.gmra.mrb[20].mxu0 %vm297_vm0, %v1629_v15 }
  0x37   :  { %1442 = vmatprep.mubr.msk.bf16.mxu0 %vm297_vm0, %v1630_v16 }
  0x3e   :  { %1443 = vmatmul.mubr.msk.bf16.gmra.mrb[24].mxu0 %vm297_vm0, %v1631_v17 }
  0x3f   :  { %1446 = vmatprep.mubr.msk.bf16.mxu0 %vm297_vm0, %v1632_v18 }
  0x46   :  { %1447 = vmatmul.mubr.msk.bf16.gmra.mrb[28].mxu0 %vm297_vm0, %v1633_v19 }
  0x47   :  { %1450 = vmatprep.mubr.msk.bf16.mxu0 %vm297_vm0, %v1634_v20 }
  0x4e   :  { %1451 = vmatmul.mubr.msk.bf16.gmra.mrb[32].mxu0 %vm297_vm0, %v1635_v21 }
  0x4f   :  { %1454 = vmatprep.mubr.msk.bf16.mxu0 %vm297_vm0, %v1636_v22 }
  0x56   :  { %1455 = vmatmul.mubr.msk.bf16.gmra.mrb[36].mxu0 %vm297_vm0, %v1637_v23 }
  0x57   :  { %1458 = vmatprep.mubr.msk.bf16.mxu0 %vm297_vm0, %v1638_v24 }
  0x5e   :  { %1459 = vmatmul.mubr.msk.bf16.gmra.mrb[40].mxu0 %vm297_vm0, %v1639_v25 }
  0x5f   :  { %1462 = vmatprep.mubr.msk.bf16.mxu0 %vm297_vm0, %v1640_v26 }
  0x66   :  { %1463 = vmatmul.mubr.msk.bf16.gmra.mrb[44].mxu0 %vm297_vm0, %v1641_v27 }
  0x67   :  { %1466 = vmatprep.mubr.msk.bf16.mxu0 %vm297_vm0, %v1642_v28 }
  0x6e   :  { %1467 = vmatmul.mubr.msk.bf16.gmra.mrb[48].mxu0 %vm297_vm0, %v1643_v29 }
  0x6f   :  { %1470 = vmatprep.mubr.msk.bf16.mxu0 %vm297_vm0, %v1644_v30 }
  0x76   :  { %1471 = vmatmul.mubr.msk.bf16.gmra.mrb[52].mxu0 %vm297_vm0, %v1645_v31 }
  0x77   :  { %1474 = vmatprep.mubr.msk.bf16.mxu0 %vm297_vm0, %v1646_v32 }
  0x7e   :  { %1475 = vmatmul.mubr.msk.bf16.gmra.mrb[56].mxu0 %vm297_vm0, %v1647_v33 }
  0x7f   :  { %1478 = vmatprep.mubr.msk.bf16.mxu0 %vm297_vm0, %v1648_v34 }
  0x86   :  { %1479 = vmatmul.mubr.msk.bf16.gmra.mrb[60].mxu0 %vm297_vm0, %v1649_v35 }
  0xe1   :  { %v1865_v37 = vpop.f32.mrb[0].mxu0 }
  0xe2   :  { %690 = vst.msk [vmem:[%s2656_s2 + $0x10] sm:$0xff] %vm687_vm2, %v1865_v37  ;;  %v1872_v38 = vpop.f32.mrb[1].mxu0  ;;  %v1883_v40 = vmul.f32 %v1865_v37, %v1865_v37 }
  0xe3   :  { %688 = vst.msk [vmem:[%s2656_s2] sm:$0xff] %vm687_vm2, %v1872_v38  ;;  %v1879_v39 = vpop.f32.mrb[2].mxu0  ;;  %v1900_v44 = vmul.f32 %v1872_v38, %v1872_v38 }
  0xe4   :  { %691 = vst.msk [vmem:[%s2656_s2 + $0x18] sm:$0xff] %vm687_vm2, %v1879_v39  ;;  %v1488_v41 = vpack.c.bf16 %v1879_v39, %v1865_v37  ;;  %v1894_v42 = vmul.f32 %v1879_v39, %v1879_v39  ;;  %v1896_v43 = vpop.f32.mrb[3].mxu0 }
  0xe5   :  { %689 = vst.msk [vmem:[%s2656_s2 + $0x8] sm:$0xff] %vm687_vm2, %v1896_v43  ;;  %v1909_v45 = vmul.f32 %v1896_v43, %v1896_v43  ;;  %v1484_v46 = vpack.c.bf16 %v1896_v43, %v1872_v38 }
  0xe9   :  { %v1917_v49 = vpop.f32.mrb[4].mxu0 }
  0xea   :  { %694 = vst.msk [vmem:[%s2656_s2 + $0x30] sm:$0xff] %vm687_vm2, %v1917_v49  ;;  %v1924_v50 = vpop.f32.mrb[5].mxu0  ;;  %v1935_v52 = vmul.f32 %v1917_v49, %v1917_v49 }
  0xeb   :  { %692 = vst.msk [vmem:[%s2656_s2 + $0x20] sm:$0xff] %vm687_vm2, %v1924_v50  ;;  %v1931_v51 = vpop.f32.mrb[6].mxu0  ;;  %v1952_v56 = vmul.f32 %v1924_v50, %v1924_v50 }
  0xec   :  { %695 = vst.msk [vmem:[%s2656_s2 + $0x38] sm:$0xff] %vm687_vm2, %v1931_v51  ;;  %v1496_v53 = vpack.c.bf16 %v1931_v51, %v1917_v49  ;;  %v1946_v54 = vmul.f32 %v1931_v51, %v1931_v51  ;;  %v1948_v55 = vpop.f32.mrb[7].mxu0 }
  0xed   :  { %693 = vst.msk [vmem:[%s2656_s2 + $0x28] sm:$0xff] %vm687_vm2, %v1948_v55  ;;  %v1492_v57 = vpack.c.bf16 %v1948_v55, %v1924_v50  ;;  %v1963_v58 = vmul.f32 %v1948_v55, %v1948_v55 }
  0xf1   :  { %v1969_v61 = vpop.f32.mrb[8].mxu0 }
  0xf2   :  { %698 = vst.msk [vmem:[%s2656_s2 + $0x50] sm:$0xff] %vm687_vm2, %v1969_v61  ;;  %v1976_v62 = vpop.f32.mrb[9].mxu0  ;;  %v1987_v0 = vmul.f32 %v1969_v61, %v1969_v61 }
  0xf3   :  { %696 = vst.msk [vmem:[%s2656_s2 + $0x40] sm:$0xff] %vm687_vm2, %v1976_v62  ;;  %v1983_v63 = vpop.f32.mrb[10].mxu0  ;;  %v2004_v4 = vmul.f32 %v1976_v62, %v1976_v62 }
  0xf4   :  { %699 = vst.msk [vmem:[%s2656_s2 + $0x58] sm:$0xff] %vm687_vm2, %v1983_v63  ;;  %v1504_v1 = vpack.c.bf16 %v1983_v63, %v1969_v61  ;;  %v1998_v2 = vmul.f32 %v1983_v63, %v1983_v63  ;;  %v2000_v3 = vpop.f32.mrb[11].mxu0 }
  0xf5   :  { %697 = vst.msk [vmem:[%s2656_s2 + $0x48] sm:$0xff] %vm687_vm2, %v2000_v3  ;;  %v1500_v5 = vpack.c.bf16 %v2000_v3, %v1976_v62  ;;  %v2015_v6 = vmul.f32 %v2000_v3, %v2000_v3 }
  0xf9   :  { %v2021_v9 = vpop.f32.mrb[12].mxu0 }
  0xfa   :  { %702 = vst.msk [vmem:[%s2656_s2 + $0x70] sm:$0xff] %vm687_vm2, %v2021_v9  ;;  %v2028_v10 = vpop.f32.mrb[13].mxu0  ;;  %v2039_v12 = vmul.f32 %v2021_v9, %v2021_v9 }
  0xfb   :  { %700 = vst.msk [vmem:[%s2656_s2 + $0x60] sm:$0xff] %vm687_vm2, %v2028_v10  ;;  %v2035_v11 = vpop.f32.mrb[14].mxu0  ;;  %v2056_v16 = vmul.f32 %v2028_v10, %v2028_v10 }
  0xfc   :  { %703 = vst.msk [vmem:[%s2656_s2 + $0x78] sm:$0xff] %vm687_vm2, %v2035_v11  ;;  %v1512_v13 = vpack.c.bf16 %v2035_v11, %v2021_v9  ;;  %v2050_v14 = vmul.f32 %v2035_v11, %v2035_v11  ;;  %v2052_v15 = vpop.f32.mrb[15].mxu0 }
  0xfd   :  { %701 = vst.msk [vmem:[%s2656_s2 + $0x68] sm:$0xff] %vm687_vm2, %v2052_v15  ;;  %v1508_v17 = vpack.c.bf16 %v2052_v15, %v2028_v10  ;;  %v2067_v18 = vmul.f32 %v2052_v15, %v2052_v15 }
 0x101   :  { %v1436_v21 = vpop.f32.mrb[16].mxu0 }
 0x102   :  { %706 = vst.msk [vmem:[%s2656_s2 + $0x90] sm:$0xff] %vm687_vm2, %v1436_v21  ;;  %v496_v22 = vpop.f32.mrb[17].mxu0  ;;  %v2081_v24 = vmul.f32 %v1436_v21, %v1436_v21 }
 0x103   :  { %704 = vst.msk [vmem:[%s2656_s2 + $0x80] sm:$0xff] %vm687_vm2, %v496_v22  ;;  %v1437_v23 = vpop.f32.mrb[18].mxu0  ;;  %v2089_v28 = vmul.f32 %v496_v22, %v496_v22 }
 0x104   :  { %707 = vst.msk [vmem:[%s2656_s2 + $0x98] sm:$0xff] %vm687_vm2, %v1437_v23  ;;  %v1486_v25 = vpack.c.bf16 %v1437_v23, %v1436_v21  ;;  %v2087_v26 = vmul.f32 %v1437_v23, %v1437_v23  ;;  %v499_v27 = vpop.f32.mrb[19].mxu0 }
 0x105   :  { %705 = vst.msk [vmem:[%s2656_s2 + $0x88] sm:$0xff] %vm687_vm2, %v499_v27  ;;  %v2095_v29 = vmul.f32 %v499_v27, %v499_v27  ;;  %v1482_v30 = vpack.c.bf16 %v499_v27, %v496_v22 }
 0x107   :  { %1483 = vmatprep.subr.bf16.mxu1 %v1482_v30 }
 0x108   :  { %1485 = vmatpush3.bf16.msra.mxu1 %v1484_v46 }
 0x109   :  { %v1440_v33 = vpop.f32.mrb[20].mxu0  ;;  %1487 = vmatprep.subr.bf16.mxu1 %v1486_v25 }
 0x10a   :  { %710 = vst.msk [vmem:[%s2656_s2 + $0xb0] sm:$0xff] %vm687_vm2, %v1440_v33  ;;  %v512_v34 = vpop.f32.mrb[21].mxu0  ;;  %v2112_v21 = vmul.f32 %v1440_v33, %v1440_v33 }
 0x10b   :  { %708 = vst.msk [vmem:[%s2656_s2 + $0xa0] sm:$0xff] %vm687_vm2, %v512_v34  ;;  %v1441_v35 = vpop.f32.mrb[22].mxu0  ;;  %v2123_v22 = vmul.f32 %v512_v34, %v512_v34 }
 0x10c   :  { %711 = vst.msk [vmem:[%s2656_s2 + $0xb8] sm:$0xff] %vm687_vm2, %v1441_v35  ;;  %v1494_v38 = vpack.c.bf16 %v1441_v35, %v1440_v33  ;;  %v2118_v43 = vmul.f32 %v1441_v35, %v1441_v35  ;;  %v515_v46 = vpop.f32.mrb[23].mxu0  ;;  %1489 = vmatpush3.bf16.msra.mxu1 %v1488_v41 }
 0x10d   :  { %709 = vst.msk [vmem:[%s2656_s2 + $0xa8] sm:$0xff] %vm687_vm2, %v515_v46  ;;  %v1490_v23 = vpack.c.bf16 %v515_v46, %v512_v34  ;;  %v2129_v25 = vmul.f32 %v515_v46, %v515_v46 }
 0x10f   :  { %1491 = vmatprep.subr.bf16.mxu1 %v1490_v23 }
 0x110   :  { %1493 = vmatpush3.bf16.msra.mxu1 %v1492_v57 }
 0x111   :  { %v1444_v37 = vpop.f32.mrb[24].mxu0  ;;  %1495 = vmatprep.subr.bf16.mxu1 %v1494_v38 }
 0x112   :  { %714 = vst.msk [vmem:[%s2656_s2 + $0xd0] sm:$0xff] %vm687_vm2, %v1444_v37  ;;  %v528_v39 = vpop.f32.mrb[25].mxu0  ;;  %v2146_v33 = vmul.f32 %v1444_v37, %v1444_v37 }
 0x113   :  { %712 = vst.msk [vmem:[%s2656_s2 + $0xc0] sm:$0xff] %vm687_vm2, %v528_v39  ;;  %v1445_v41 = vpop.f32.mrb[26].mxu0  ;;  %v2157_v34 = vmul.f32 %v528_v39, %v528_v39 }
 0x114   :  { %715 = vst.msk [vmem:[%s2656_s2 + $0xd8] sm:$0xff] %vm687_vm2, %v1445_v41  ;;  %v1502_v50 = vpack.c.bf16 %v1445_v41, %v1444_v37  ;;  %v2152_v55 = vmul.f32 %v1445_v41, %v1445_v41  ;;  %v531_v57 = vpop.f32.mrb[27].mxu0  ;;  %1497 = vmatpush3.bf16.msra.mxu1 %v1496_v53 }
 0x115   :  { %713 = vst.msk [vmem:[%s2656_s2 + $0xc8] sm:$0xff] %vm687_vm2, %v531_v57  ;;  %v1498_v35 = vpack.c.bf16 %v531_v57, %v528_v39  ;;  %v2163_v38 = vmul.f32 %v531_v57, %v531_v57 }
 0x117   :  { %1499 = vmatprep.subr.bf16.mxu1 %v1498_v35 }
 0x118   :  { %1501 = vmatpush3.bf16.msra.mxu1 %v1500_v5 }
 0x119   :  { %v1448_v49 = vpop.f32.mrb[28].mxu0  ;;  %1503 = vmatprep.subr.bf16.mxu1 %v1502_v50 }
 0x11a   :  { %718 = vst.msk [vmem:[%s2656_s2 + $0xf0] sm:$0xff] %vm687_vm2, %v1448_v49  ;;  %v544_v51 = vpop.f32.mrb[29].mxu0  ;;  %v2180_v37 = vmul.f32 %v1448_v49, %v1448_v49 }
 0x11b   :  { %716 = vst.msk [vmem:[%s2656_s2 + $0xe0] sm:$0xff] %vm687_vm2, %v544_v51  ;;  %v1449_v53 = vpop.f32.mrb[30].mxu0  ;;  %v2191_v39 = vmul.f32 %v544_v51, %v544_v51 }
 0x11c   :  { %719 = vst.msk [vmem:[%s2656_s2 + $0xf8] sm:$0xff] %vm687_vm2, %v1449_v53  ;;  %v1510_v62 = vpack.c.bf16 %v1449_v53, %v1448_v49  ;;  %v2186_v3 = vmul.f32 %v1449_v53, %v1449_v53  ;;  %v547_v5 = vpop.f32.mrb[31].mxu0  ;;  %1505 = vmatpush3.bf16.msra.mxu1 %v1504_v1 }
 0x11d   :  { %717 = vst.msk [vmem:[%s2656_s2 + $0xe8] sm:$0xff] %vm687_vm2, %v547_v5  ;;  %v1506_v41 = vpack.c.bf16 %v547_v5, %v544_v51  ;;  %v2197_v50 = vmul.f32 %v547_v5, %v547_v5 }
 0x11f   :  { %1507 = vmatprep.subr.bf16.mxu1 %v1506_v41 }
 0x120   :  { %1509 = vmatpush3.bf16.msra.mxu1 %v1508_v17 }
 0x121   :  { %v2206_v61 = vpop.f32.mrb[32].mxu0  ;;  %1511 = vmatprep.subr.bf16.mxu1 %v1510_v62 }
 0x122   :  { %722 = vst.msk [vmem:[%s2656_s2 + $0x110] sm:$0xff] %vm687_vm2, %v2206_v61  ;;  %v2213_v63 = vpop.f32.mrb[33].mxu0  ;;  %v2224_v10 = vmul.f32 %v2206_v61, %v2206_v61 }
 0x123   :  { %720 = vst.msk [vmem:[%s2656_s2 + $0x100] sm:$0xff] %vm687_vm2, %v2213_v63  ;;  %v2220_v1 = vpop.f32.mrb[34].mxu0  ;;  %v2244_v51 = vmul.f32 %v2213_v63, %v2213_v63 }
 0x124   :  { %2676 = vst [vmem:[#allocation8_spill] sm:$0xff] %v2224_v10  ;;  %723 = vst.msk [vmem:[%s2656_s2 + $0x118] sm:$0xff] %vm687_vm2, %v2220_v1  ;;  %v2235_v17 = vmul.f32 %v2220_v1, %v2220_v1  ;;  %v2237_v49 = vpop.f32.mrb[35].mxu0  ;;  %1513 = vmatpush3.bf16.msra.mxu1 %v1512_v13 }
 0x125   :  { %721 = vst.msk [vmem:[%s2656_s2 + $0x108] sm:$0xff] %vm687_vm2, %v2237_v49  ;;  %v2255_v62 = vmul.f32 %v2237_v49, %v2237_v49 }
 0x127   :  { %825 = vmatmul.mubr.f32.vlgmr.msra.gmra.mrb[0].mxu1 %v2659_v36 }
 0x128   :  { %894 = vmatprep.mubr.f32.mxu1 %v2659_v36 }
 0x129   :  { %v2263_v13 = vpop.f32.mrb[36].mxu0 }
 0x12a   :  { %726 = vst.msk [vmem:[%s2656_s2 + $0x130] sm:$0xff] %vm687_vm2, %v2263_v13  ;;  %v2270_v5 = vpop.f32.mrb[37].mxu0  ;;  %v2281_v9 = vmul.f32 %v2263_v13, %v2263_v13 }
 0x12b   :  { %724 = vst.msk [vmem:[%s2656_s2 + $0x120] sm:$0xff] %vm687_vm2, %v2270_v5  ;;  %v2277_v41 = vpop.f32.mrb[38].mxu0  ;;  %v2298_v20 = vmul.f32 %v2270_v5, %v2270_v5 }
 0x12c   :  { %2677 = vst [vmem:[#allocation9_spill] sm:$0xff] %v2281_v9  ;;  %727 = vst.msk [vmem:[%s2656_s2 + $0x138] sm:$0xff] %vm687_vm2, %v2277_v41  ;;  %v2292_v19 = vmul.f32 %v2277_v41, %v2277_v41  ;;  %v2294_v57 = vpop.f32.mrb[39].mxu0 }
 0x12d   :  { %2679 = vst [vmem:[#allocation11_spill] sm:$0xff] %v2298_v20  ;;  %725 = vst.msk [vmem:[%s2656_s2 + $0x128] sm:$0xff] %vm687_vm2, %v2294_v57  ;;  %v2309_v7 = vmul.f32 %v2294_v57, %v2294_v57 }
 0x12e   :  { %2678 = vst [vmem:[#allocation10_spill] sm:$0xff] %v2292_v19 }
 0x12f   :  { %2680 = vst [vmem:[#allocation12_spill] sm:$0xff] %v2309_v7 }
 0x131   :  { %v2315_v23 = vpop.f32.mrb[40].mxu0 }
 0x132   :  { %730 = vst.msk [vmem:[%s2656_s2 + $0x150] sm:$0xff] %vm687_vm2, %v2315_v23  ;;  %v2322_v59 = vpop.f32.mrb[41].mxu0  ;;  %v2333_v8 = vmul.f32 %v2315_v23, %v2315_v23 }
 0x133   :  { %728 = vst.msk [vmem:[%s2656_s2 + $0x140] sm:$0xff] %vm687_vm2, %v2322_v59  ;;  %v2329_v46 = vpop.f32.mrb[42].mxu0  ;;  %v2350_v47 = vmul.f32 %v2322_v59, %v2322_v59 }
 0x134   :  { %2681 = vst [vmem:[#allocation13_spill] sm:$0xff] %v2333_v8  ;;  %731 = vst.msk [vmem:[%s2656_s2 + $0x158] sm:$0xff] %vm687_vm2, %v2329_v46  ;;  %v2344_v60 = vmul.f32 %v2329_v46, %v2329_v46  ;;  %v2346_v30 = vpop.f32.mrb[43].mxu0 }
 0x135   :  { %2683 = vst [vmem:[#allocation15_spill] sm:$0xff] %v2350_v47  ;;  %729 = vst.msk [vmem:[%s2656_s2 + $0x148] sm:$0xff] %vm687_vm2, %v2346_v30  ;;  %v2361_v48 = vmul.f32 %v2346_v30, %v2346_v30 }
 0x136   :  { %2682 = vst [vmem:[#allocation14_spill] sm:$0xff] %v2344_v60 }
 0x137   :  { %2684 = vst [vmem:[#allocation16_spill] sm:$0xff] %v2361_v48 }
 0x139   :  { %v2367_v27 = vpop.f32.mrb[44].mxu0 }
 0x13a   :  { %734 = vst.msk [vmem:[%s2656_s2 + $0x170] sm:$0xff] %vm687_vm2, %v2367_v27  ;;  %v2374_v11 = vpop.f32.mrb[45].mxu0  ;;  %v2385_v32 = vmul.f32 %v2367_v27, %v2367_v27 }
 0x13b   :  { %732 = vst.msk [vmem:[%s2656_s2 + $0x160] sm:$0xff] %vm687_vm2, %v2374_v11  ;;  %v2381_v36 = vpop.f32.mrb[46].mxu0  ;;  %v2402_v53 = vmul.f32 %v2374_v11, %v2374_v11 }
 0x13c   :  { %2685 = vst [vmem:[#allocation17_spill] sm:$0xff] %v2385_v32  ;;  %735 = vst.msk [vmem:[%s2656_s2 + $0x178] sm:$0xff] %vm687_vm2, %v2381_v36  ;;  %v2396_v35 = vmul.f32 %v2381_v36, %v2381_v36  ;;  %v2398_v15 = vpop.f32.mrb[47].mxu0 }
 0x13d   :  { %2687 = vst [vmem:[#allocation19_spill] sm:$0xff] %v2402_v53  ;;  %733 = vst.msk [vmem:[%s2656_s2 + $0x168] sm:$0xff] %vm687_vm2, %v2398_v15  ;;  %v2413_v31 = vmul.f32 %v2398_v15, %v2398_v15 }
 0x13e   :  { %2686 = vst [vmem:[#allocation18_spill] sm:$0xff] %v2396_v35 }
 0x13f   :  { %2688 = vst [vmem:[#allocation20_spill] sm:$0xff] %v2413_v31 }
 0x141   :  { %v1468_v48 = vpop.f32.mrb[48].mxu0 }
 0x142   :  { %738 = vst.msk [vmem:[%s2656_s2 + $0x190] sm:$0xff] %vm687_vm2, %v1468_v48  ;;  %v624_v9 = vpop.f32.mrb[49].mxu0  ;;  %v2427_v19 = vmul.f32 %v1468_v48, %v1468_v48 }
 0x143   :  { %736 = vst.msk [vmem:[%s2656_s2 + $0x180] sm:$0xff] %vm687_vm2, %v624_v9  ;;  %v1469_v8 = vpop.f32.mrb[50].mxu0  ;;  %v2435_v35 = vmul.f32 %v624_v9, %v624_v9 }
 0x144   :  { %739 = vst.msk [vmem:[%s2656_s2 + $0x198] sm:$0xff] %vm687_vm2, %v1469_v8  ;;  %v1518_v60 = vpack.c.bf16 %v1469_v8, %v1468_v48  ;;  %v2433_v47 = vmul.f32 %v1469_v8, %v1469_v8  ;;  %v627_v32 = vpop.f32.mrb[51].mxu0  ;;  %v2689_v8 = vpack.c.bf16 %v2237_v49, %v2213_v63 }
 0x145   :  { %737 = vst.msk [vmem:[%s2656_s2 + $0x188] sm:$0xff] %vm687_vm2, %v627_v32  ;;  %v1514_v53 = vpack.c.bf16 %v627_v32, %v624_v9  ;;  %v2441_v31 = vmul.f32 %v627_v32, %v627_v32 }
 0x147   :  { %1515 = vmatprep.subr.bf16.mxu1 %v1514_v53 }
 0x148   :  { %1517 = vmatpush3.bf16.msra.mxu1 %v2689_v8  ;;  %v2692_v8 = vpack.c.bf16 %v2220_v1, %v2206_v61  ;;  %v2693_v61 = vpack.c.bf16 %v2294_v57, %v2270_v5 }
 0x149   :  { %v1472_v7 = vpop.f32.mrb[52].mxu0  ;;  %1519 = vmatprep.subr.bf16.mxu1 %v1518_v60 }
 0x14a   :  { %742 = vst.msk [vmem:[%s2656_s2 + $0x1b0] sm:$0xff] %vm687_vm2, %v1472_v7  ;;  %v640_v32 = vpop.f32.mrb[53].mxu0  ;;  %v2458_v9 = vmul.f32 %v1472_v7, %v1472_v7 }
 0x14b   :  { %740 = vst.msk [vmem:[%s2656_s2 + $0x1a0] sm:$0xff] %vm687_vm2, %v640_v32  ;;  %v1473_v53 = vpop.f32.mrb[54].mxu0  ;;  %v2469_v20 = vmul.f32 %v640_v32, %v640_v32 }
 0x14c   :  { %2690 = vst [vmem:[#allocation21_spill] sm:$0xff] %v2458_v9  ;;  %743 = vst.msk [vmem:[%s2656_s2 + $0x1b8] sm:$0xff] %vm687_vm2, %v1473_v53  ;;  %v1526_v60 = vpack.c.bf16 %v1473_v53, %v1472_v7  ;;  %v2464_v63 = vmul.f32 %v1473_v53, %v1473_v53  ;;  %v643_v49 = vpop.f32.mrb[55].mxu0  ;;  %1521 = vmatpush3.bf16.msra.mxu1 %v2692_v8  ;;  %v2694_v8 = vpack.c.bf16 %v2277_v41, %v2263_v13 }
 0x14d   :  { %741 = vst.msk [vmem:[%s2656_s2 + $0x1a8] sm:$0xff] %vm687_vm2, %v643_v49  ;;  %v1522_v48 = vpack.c.bf16 %v643_v49, %v640_v32  ;;  %v2475_v10 = vmul.f32 %v643_v49, %v643_v49 }
 0x14e   :  { %2691 = vst [vmem:[#allocation22_spill] sm:$0xff] %v2464_v63 }
 0x14f   :  { %1523 = vmatprep.subr.bf16.mxu1 %v1522_v48 }
 0x150   :  { %1525 = vmatpush3.bf16.msra.mxu1 %v2693_v61 }
 0x151   :  { %v1476_v1 = vpop.f32.mrb[56].mxu0  ;;  %1527 = vmatprep.subr.bf16.mxu1 %v1526_v60 }
 0x152   :  { %746 = vst.msk [vmem:[%s2656_s2 + $0x1d0] sm:$0xff] %vm687_vm2, %v1476_v1  ;;  %v656_v32 = vpop.f32.mrb[57].mxu0  ;;  %v2492_v49 = vmul.f32 %v1476_v1, %v1476_v1 }
 0x153   :  { %744 = vst.msk [vmem:[%s2656_s2 + $0x1c0] sm:$0xff] %vm687_vm2, %v656_v32  ;;  %v1477_v48 = vpop.f32.mrb[58].mxu0  ;;  %v960_v61 = vmul.f32 %v656_v32, %v656_v32 }
 0x154   :  { %747 = vst.msk [vmem:[%s2656_s2 + $0x1d8] sm:$0xff] %vm687_vm2, %v1477_v48  ;;  %v1534_v57 = vpack.c.bf16 %v1477_v48, %v1476_v1  ;;  %v2498_v5 = vmul.f32 %v1477_v48, %v1477_v48  ;;  %v659_v60 = vpop.f32.mrb[59].mxu0  ;;  %1529 = vmatpush3.bf16.msra.mxu1 %v2694_v8  ;;  %v2695_v48 = vpack.c.bf16 %v2346_v30, %v2322_v59 }
 0x155   :  { %745 = vst.msk [vmem:[%s2656_s2 + $0x1c8] sm:$0xff] %vm687_vm2, %v659_v60  ;;  %v1530_v7 = vpack.c.bf16 %v659_v60, %v656_v32  ;;  %v961_v53 = vmul.f32 %v659_v60, %v659_v60  ;;  %v2696_v32 = vpack.c.bf16 %v2329_v46, %v2315_v23  ;;  %v2698_v46 = vpack.c.bf16 %v2381_v36, %v2367_v27  ;;  %v2729_v27 = vld [vmem:[#allocation9_spill] sm:$0xff] }
 0x156   :  { %v1598_v9 = vpack.c.bf16 %v2498_v5, %v2492_v49  ;;  %v2699_v23 = vpack.c.bf16 %v2095_v29, %v2089_v28  ;;  %v2703_v36 = vpack.c.bf16 %v1894_v42, %v1883_v40  ;;  %v2704_v28 = vpack.c.bf16 %v2129_v25, %v2123_v22  ;;  %v2728_v25 = vld [vmem:[#allocation10_spill] sm:$0xff] }
 0x157   :  { %1531 = vmatprep.subr.bf16.mxu1 %v1530_v7  ;;  %v1594_v1 = vpack.c.bf16 %v961_v53, %v960_v61  ;;  %v2700_v61 = vmov 1.0   ;;  %v2705_v29 = vpack.c.bf16 %v1963_v58, %v1952_v56  ;;  %v2708_v40 = vpack.c.bf16 %v2163_v38, %v2157_v34  ;;  %v2735_v34 = vld [vmem:[#allocation13_spill] sm:$0xff] }
 0x158   :  { %1533 = vmatpush3.bf16.msra.mxu1 %v2695_v48  ;;  %v2701_v48 = vpack.c.bf16 %v1909_v45, %v1900_v44  ;;  %v2706_v44 = vpack.c.bf16 %v2118_v43, %v2112_v21  ;;  %v2707_v45 = vpack.c.bf16 %v1946_v54, %v1935_v52  ;;  %v2709_v42 = vpack.c.bf16 %v2015_v6, %v2004_v4  ;;  %v2725_v21 = vld [vmem:[#allocation22_spill] sm:$0xff]  ;;  %v2726_v43 = vld [vmem:[#allocation21_spill] sm:$0xff] }
 0x159   :  { %v1480_v63 = vpop.f32.mrb[60].mxu0  ;;  %1535 = vmatprep.subr.bf16.mxu1 %v1534_v57  ;;  %v2710_v56 = vpack.c.bf16 %v2152_v55, %v2146_v33  ;;  %v2711_v58 = vpack.c.bf16 %v1998_v2, %v1987_v0  ;;  %v2712_v52 = vpack.c.bf16 %v2197_v50, %v2191_v39  ;;  %v2713_v54 = vpack.c.bf16 %v2067_v18, %v2056_v16  ;;  %v2719_v18 = vld [vmem:[#allocation8_spill] sm:$0xff]  ;;  %v2732_v33 = vld [vmem:[#allocation15_spill] sm:$0xff]  ;;  %v2740_v50 = vld [vmem:[#allocation18_spill] sm:$0xff] }
 0x15a   :  { %750 = vst.msk [vmem:[%s2656_s2 + $0x1f0] sm:$0xff] %vm687_vm2, %v1480_v63  ;;  %v672_v13 = vpop.f32.mrb[61].mxu0  ;;  %v966_v7 = vmul.f32 %v1480_v63, %v1480_v63  ;;  %v2714_v4 = vpack.c.bf16 %v2186_v3, %v2180_v37  ;;  %v2715_v6 = vpack.c.bf16 %v2050_v14, %v2039_v12  ;;  %v2716_v0 = vpack.c.bf16 %v2441_v31, %v2435_v35  ;;  %v2737_v37 = vld [vmem:[#allocation20_spill] sm:$0xff]  ;;  %v2738_v3 = vld [vmem:[#allocation19_spill] sm:$0xff]  ;;  %v2741_v35 = vld [vmem:[#allocation17_spill] sm:$0xff] }
 0x15b   :  { %748 = vst.msk [vmem:[%s2656_s2 + $0x1e0] sm:$0xff] %vm687_vm2, %v672_v13  ;;  %v1481_v41 = vpop.f32.mrb[62].mxu0  ;;  %v964_v49 = vmul.f32 %v672_v13, %v672_v13  ;;  %v2717_v2 = vpack.c.bf16 %v2255_v62, %v2244_v51  ;;  %v2718_v16 = vpack.c.bf16 %v2433_v47, %v2427_v19  ;;  %v2720_v12 = vpack.c.bf16 %v2235_v17, %v2719_v18  ;;  %v2731_v19 = vld [vmem:[#allocation16_spill] sm:$0xff] }
 0x15c   :  { %751 = vst.msk [vmem:[%s2656_s2 + $0x1f8] sm:$0xff] %vm687_vm2, %v1481_v41  ;;  %v1542_v59 = vpack.c.bf16 %v1481_v41, %v1480_v63  ;;  %v967_v30 = vmul.f32 %v1481_v41, %v1481_v41  ;;  %v675_v53 = vpop.f32.mrb[63].mxu0  ;;  %1537 = vmatpush3.bf16.msra.mxu1 %v2696_v32  ;;  %v2697_v63 = vpack.c.bf16 %v2398_v15, %v2374_v11  ;;  %v1699_v17 = vmov 0.0  }
 0x15d   :  { %749 = vst.msk [vmem:[%s2656_s2 + $0x1e8] sm:$0xff] %vm687_vm2, %v675_v53  ;;  %v1538_v57 = vpack.c.bf16 %v675_v53, %v672_v13  ;;  %v965_v5 = vmul.f32 %v675_v53, %v675_v53  ;;  %v2702_v15 = vpack.c.bf16 %v2087_v26, %v2081_v24  ;;  %v2721_v14 = vpack.c.bf16 %v2475_v10, %v2469_v20  ;;  %v2722_v24 = vld [vmem:[#allocation12_spill] sm:$0xff]  ;;  %v2723_v26 = vld [vmem:[#allocation11_spill] sm:$0xff]  ;;  %v2734_v20 = vld [vmem:[#allocation14_spill] sm:$0xff]  ;;  %s1700_s2 = smov [#allocation2]  }
 0x15e   :  { %v1606_v60 = vpack.c.bf16 %v967_v30, %v966_v7  ;;  %v2724_v31 = vpack.c.bf16 %v2722_v24, %v2723_v26  ;;  %v2727_v22 = vpack.c.bf16 %v2725_v21, %v2726_v43  ;;  %v2730_v47 = vpack.c.bf16 %v2728_v25, %v2729_v27  ;;  %757 = vst.msk [vmem:[#allocation2] sm:$0x1] %vm756_vm3, %v1699_v17  ;;  %s1126_s19 = sshll.u32 %s1700_s2, 4  ;;  %s1127_s19 = int_to_ptr.vmem [resolvable:$true] %s1126_s19 }
 0x15f   :  { %v1602_v8 = vpack.c.bf16 %v965_v5, %v964_v49  ;;  %1539 = vmatprep.subr.bf16.mxu1 %v1538_v57  ;;  %v2733_v55 = vpack.c.bf16 %v2731_v19, %v2732_v33  ;;  %v2736_v38 = vpack.c.bf16 %v2734_v20, %v2735_v34  ;;  %v2739_v39 = vpack.c.bf16 %v2737_v37, %v2738_v3  ;;  %s1650_s20 = scalar_lea.vmem %s1127_s19, 16  ;;  %s1654_s21 = scalar_lea.vmem %s1127_s19, 32 }
 0x160   :  { %1541 = vmatpush3.bf16.msra.mxu1 %v2697_v63  ;;  %v2742_v10 = vpack.c.bf16 %v2740_v50, %v2741_v35  ;;  %758 = vst.msk [vmem:[#allocation4] sm:$0x1] %vm756_vm3, %v1699_v17  ;;  %p1651_p0 = scmp.ne.s32.totalorder %s1127_s19, %s1650_s20  ;;  %p1655_p1 = scmp.lt.s32.totalorder %s1127_s19, %s1127_s19 }
 0x161   :  { %1543 = vmatprep.subr.bf16.mxu1 %v1542_v59  ;;  %p1656_p2 = scmp.lt.s32.totalorder %s1654_s21, %s1650_s20 }
 0x163   :  { %p1657_p3 = por %p1656_p2, %p1655_p1 }
 0x164   :  { %1545 = vmatpush3.bf16.msra.mxu1 %v2698_v46 }
 0x165   :  { %1547 = vmatprep.subr.bf16.mxu1 %v2699_v23  ;;  %v759_v41 = vld [vmem:[#allocation2] sm:$0x1]  ;;  %p1658_p4 = pnand %p1657_p3, %p1651_p0 }
 0x167   :  { %895 = vmatmul.mubr.f32.vlgmr.msra.gmra.mrb[2].mxu1 %v2700_v61 }
 0x168   :  { %1549 = vmatpush3.bf16.msra.mxu1 %v2701_v48  ;;  %1032 = vmatprep.mubr.f32.mxu1 %v2700_v61 }
 0x169   :  { %1551 = vmatprep.subr.bf16.mxu1 %v2702_v15 }
 0x16c   :  { %1553 = vmatpush3.bf16.msra.mxu1 %v2703_v36 }
 0x16d   :  { %1555 = vmatprep.subr.bf16.mxu1 %v2704_v28 }
 0x170   :  { %1557 = vmatpush3.bf16.msra.mxu1 %v2705_v29 }
 0x171   :  { %1559 = vmatprep.subr.bf16.mxu1 %v2706_v44 }
 0x174   :  { %1561 = vmatpush3.bf16.msra.mxu1 %v2707_v45 }
 0x175   :  { %1563 = vmatprep.subr.bf16.mxu1 %v2708_v40 }
 0x178   :  { %1565 = vmatpush3.bf16.msra.mxu1 %v2709_v42 }
 0x179   :  { %1567 = vmatprep.subr.bf16.mxu1 %v2710_v56 }
 0x17c   :  { %1569 = vmatpush3.bf16.msra.mxu1 %v2711_v58 }
 0x17d   :  { %1571 = vmatprep.subr.bf16.mxu1 %v2712_v52 }
 0x180   :  { %1573 = vmatpush3.bf16.msra.mxu1 %v2713_v54 }
 0x181   :  { %1575 = vmatprep.subr.bf16.mxu1 %v2714_v4 }
 0x184   :  { %1577 = vmatpush3.bf16.msra.mxu1 %v2715_v6 }
 0x185   :  { %1579 = vmatprep.subr.bf16.mxu1 %v2716_v0 }
 0x187   :  { %1033 = vmatmul.mubr.f32.vlgmr.msra.gmra.mrb[4].mxu1 %v2700_v61 }
 0x188   :  { %1581 = vmatpush3.bf16.msra.mxu1 %v2717_v2  ;;  %1102 = vmatprep.mubr.f32.mxu1 %v2700_v61 }
 0x189   :  { %1583 = vmatprep.subr.bf16.mxu1 %v2718_v16 }
 0x18c   :  { %1585 = vmatpush3.bf16.msra.mxu1 %v2720_v12 }
 0x18d   :  { %1587 = vmatprep.subr.bf16.mxu1 %v2721_v14 }
 0x190   :  { %1589 = vmatpush3.bf16.msra.mxu1 %v2724_v31 }
 0x191   :  { %1591 = vmatprep.subr.bf16.mxu1 %v2727_v22 }
 0x194   :  { %1593 = vmatpush3.bf16.msra.mxu1 %v2730_v47 }
 0x195   :  { %1595 = vmatprep.subr.bf16.mxu1 %v1594_v1 }
 0x198   :  { %1597 = vmatpush3.bf16.msra.mxu1 %v2733_v55 }
 0x199   :  { %1599 = vmatprep.subr.bf16.mxu1 %v1598_v9 }
 0x19c   :  { %1601 = vmatpush3.bf16.msra.mxu1 %v2736_v38 }
 0x19d   :  { %1603 = vmatprep.subr.bf16.mxu1 %v1602_v8 }
 0x1a0   :  { %1605 = vmatpush3.bf16.msra.mxu1 %v2739_v39 }
 0x1a1   :  { %1607 = vmatprep.subr.bf16.mxu1 %v1606_v60 }
 0x1a4   :  { %1609 = vmatpush3.bf16.msra.mxu1 %v2742_v10 }
 0x1a7   :  { %1103 = vmatmul.mubr.f32.vlgmr.msra.gmra.mrb[6].mxu1 %v2700_v61 }
 0x1fa   :  { %v1304_v51 = vpop.f32.mrb[0].mxu1 }
 0x1fb   :  { %v1305_v62 = vpop.f32.mrb[1].mxu1 }
 0x1fc   :  { %v1306_v11 = vadd.f32 %v1305_v62, %v1304_v51 }
 0x23a   :  { %v1339_v9 = vpop.f32.mrb[2].mxu1 }
 0x23b   :  { %v1340_v1 = vpop.f32.mrb[3].mxu1 }
 0x23c   :  { %v1341_v13 = vadd.f32 %v1340_v1, %v1339_v9 }
 0x23e   :  { %v897_v7 = vadd.f32 %v1341_v13, %v1306_v11 }
 0x240   :  { %v900_v59 = vadd.f32 %v897_v7, %v759_v41 }
 0x242   :  { %902 = vst.msk [vmem:[#allocation2] sm:$0x1] %vm756_vm3, %v900_v59 }
 0x243   :  { %1661 = shalt.err (!%p1658_p4)
}
 0x244   :  { %s1662_s24 = scalar_lea.hbm %s2657_s3, 16 }
 0x245   :  { %p1663_p5 = scmp.ne.s32.totalorder %s2657_s3, %s1662_s24  ;;  %p1666_p6 = scmp.lt.u32.totalorder %s1662_s24, %s2657_s3 }
 0x247   :  { %p1668_p7 = pnand %p1666_p6, %p1663_p5 }
 0x249   :  { %1671 = shalt.err (!%p1668_p7)
}
 0x24a   :  { %1129 = dma.vmem_to_hbm [thread:$0]  %s1127_s19, 16, %s2657_s3, [#allocation3]   ;;  %v903_v60 = vld [vmem:[#allocation4] sm:$0x1] }
 0x24b   :  { %s1701_s30 = smov [#allocation4]  }
 0x24c   :  { %s1136_s5 = sshll.u32 %s1701_s30, 4  ;;  %s1137_s5 = int_to_ptr.vmem [resolvable:$true] %s1136_s5 }
 0x24d   :  { %s1672_s6 = scalar_lea.vmem %s1137_s5, 16  ;;  %s1676_s0 = scalar_lea.vmem %s1137_s5, 32 }
 0x24e   :  { %p1673_p8 = scmp.ne.s32.totalorder %s1137_s5, %s1672_s6  ;;  %p1677_p9 = scmp.lt.s32.totalorder %s1137_s5, %s1137_s5 }
 0x24f   :  { %p1678_p10 = scmp.lt.s32.totalorder %s1676_s0, %s1672_s6 }
 0x251   :  { %p1679_p11 = por %p1678_p10, %p1677_p9 }
 0x253   :  { %p1680_p12 = pnand %p1679_p11, %p1673_p8 }
 0x25a   :  { %v1374_v30 = vpop.f32.mrb[4].mxu1 }
 0x25b   :  { %v1375_v53 = vpop.f32.mrb[5].mxu1 }
 0x25c   :  { %v1376_v32 = vadd.f32 %v1375_v53, %v1374_v30 }
 0x27a   :  { %v1409_v49 = vpop.f32.mrb[6].mxu1 }
 0x27b   :  { %v1410_v57 = vpop.f32.mrb[7].mxu1 }
 0x27c   :  { %v1411_v5 = vadd.f32 %v1410_v57, %v1409_v49 }
 0x27e   :  { %v1105_v8 = vadd.f32 %v1411_v5, %v1376_v32 }
 0x280   :  { %v1108_v63 = vadd.f32 %v1105_v8, %v903_v60 }
 0x282   :  { %1109 = vst.msk [vmem:[#allocation4] sm:$0x1] %vm756_vm3, %v1108_v63 }
 0x283   :  { %1683 = shalt.err (!%p1680_p12)
}
 0x284   :  { %s1684_s8 = scalar_lea.hbm %s2658_s4, 16 }
 0x285   :  { %p1685_p13 = scmp.ne.s32.totalorder %s2658_s4, %s1684_s8  ;;  %p1688_p0 = scmp.lt.u32.totalorder %s1684_s8, %s2658_s4 }
 0x287   :  { %p1690_p1 = pnand %p1688_p0, %p1685_p13 }
 0x289   :  { %1693 = shalt.err (!%p1690_p1)
}
 0x28a   :  { %1139 = dma.vmem_to_hbm [thread:$0]  %s1137_s5, 16, %s2658_s4, [#allocation5]  }
 0x28b   :  { %1694 = dma.done.wait [#allocation3], 16  }
 0x28c   :  { %1695 = vsyncadd [#allocation3], 4294967280 }
 0x28d   :  { %1696 = dma.done.wait [#allocation5], 16  }
 0x28e   :  { %1697 = vsyncadd [#allocation5], 4294967280 }
 0x28f   :  { %1154 = vsyncpa [#allocation3], 1 }
 0x290   :  { %1155 = vsyncpa [#allocation5], 1 }

</bundles_post_ra>
